<compile_context>
chip_gen: v5e
topology: v5e:2x2
jax: 0.10.0
libtpu: 0.0.40
codegen_flags: <defaults>
</compile_context>

<pallas_src>
import functools

import jax
import jax.numpy as jnp
from jax import lax
from jax.experimental import pallas as pl
from jax.experimental.pallas import tpu as pltpu

_LN_EPS = 1e-5  # PyTorch nn.LayerNorm default


# ----------------------------------------------------------------------------
# Fused tree kernel (batch on the lane axis)
# ----------------------------------------------------------------------------
def _fused_tree_kernel(level_meta, x_ref, *refs):
    """level_meta: tuple of (num_linear, n_nodes) per tree level.

    Activations h have shape (features, TB): features on sublanes, batch on
    lanes.  refs = flattened per-level packed params
      [Wt_0, b_0, ..., Wt_{nl-1}, b_{nl-1}, Msum, Mbcast, gamma, beta] * levels,
    followed by out_ref.
    """
    o_ref = refs[-1]
    params = refs[:-1]

    h = x_ref[...].astype(jnp.float32)           # (d_in, TB)
    idx = 0
    for num_linear, n_nodes in level_meta:
        del n_nodes  # chunk structure is baked into the mask matrices
        for _ in range(num_linear):
            wt = params[idx][...]                # (d_out_tot, d_in_tot), pre-transposed
            b = params[idx + 1][...]             # (d_out_tot, 1) -> broadcast over lanes
            idx += 2
            # NOTE: if layer dims ever grow to be MXU-bound on v6e/v7x, cast
            # wt/h to bf16 here (keep preferred_element_type=f32 accumulation).
            h = jnp.dot(wt, h, preferred_element_type=jnp.float32) + b
            h = jnp.maximum(h, 0.0)              # ReLU
        msum = params[idx][...]                  # (n_nodes, F)  == chunk mask / d
        mb = params[idx + 1][...]                # (F, n_nodes)  == chunk mask^T
        gamma = params[idx + 2][...]             # (F, 1)
        beta = params[idx + 3][...]              # (F, 1)
        idx += 4
        # Per-node LayerNorm; chunk statistics on the MXU (idle otherwise),
        # broadcast back with the transposed 0/1 mask.  Exact LayerNorm math.
        mean = jnp.dot(msum, h, preferred_element_type=jnp.float32)      # (n_nodes, TB)
        c = h - jnp.dot(mb, mean, preferred_element_type=jnp.float32)    # (F, TB)
        var = jnp.dot(msum, c * c, preferred_element_type=jnp.float32)   # (n_nodes, TB)
        inv = lax.rsqrt(jnp.dot(mb, var, preferred_element_type=jnp.float32) + _LN_EPS)
        h = c * inv * gamma + beta
    o_ref[...] = h.astype(o_ref.dtype)


# ----------------------------------------------------------------------------
# Parameter tree construction (mirrors patch_pipe.__init__), deterministic init
# ----------------------------------------------------------------------------
def init_patch_pipe(key, sizes, sizes_pr_level, forks):
    if len(forks) < 1:
        my_sizes = list(sizes)
    else:
        my_sizes = list(sizes[:sizes_pr_level])

    node = {"linears": [], "children": []}
    for i in range(len(my_sizes) - 1):
        key, kw, kb = jax.random.split(key, 3)
        d1, d2 = my_sizes[i], my_sizes[i + 1]
        bound = 1.0 / (d1 ** 0.5)
        w = jax.random.uniform(kw, (d1, d2), jnp.float32, -bound, bound)
        b = jax.random.uniform(kb, (d2,), jnp.float32, -bound, bound)
        node["linears"].append((w, b))
    node["gamma"] = jnp.ones((my_sizes[-1],), jnp.float32)
    node["beta"] = jnp.zeros((my_sizes[-1],), jnp.float32)

    if len(forks) > 0:
        for _ in range(forks[0]):
            key, sub = jax.random.split(key)
            node["children"].append(
                init_patch_pipe(sub, sizes[sizes_pr_level - 1:], sizes_pr_level,
                                forks[1:]))
    return node


def _collect_levels(root):
    levels, frontier = [], [root]
    while frontier:
        levels.append(frontier)
        frontier = [c for n in frontier for c in n["children"]]
    return levels


def pack_patch_pipe(root):
    """Pack the per-node tree into per-level TRANSPOSED block(-diag) matrices.

    Weights are stored as W^T blocks so the kernel runs h_new = Wt @ h with the
    batch on the lane axis.  LayerNorm chunk-mask matrices are precomputed so
    the kernel can do LN statistics with MXU matmuls.
    """
    levels = _collect_levels(root)
    flat, meta = [], []
    for li, nodes in enumerate(levels):
        n_nodes = len(nodes)
        fan = len(levels[li]) // len(levels[li - 1]) if li > 0 else 1
        n_parents = len(levels[li - 1]) if li > 0 else 1
        num_linear = len(nodes[0]["linears"])
        meta.append((num_linear, n_nodes))
        for l in range(num_linear):
            d_in, d_out = nodes[0]["linears"][l][0].shape
            n_in_blocks = n_parents if l == 0 else n_nodes
            wp = jnp.zeros((n_nodes * d_out, n_in_blocks * d_in), jnp.float32)
            biases = []
            for j, node in enumerate(nodes):
                w, b = node["linears"][l]
                if l == 0:
                    ib = j // fan if li > 0 else 0   # read parent's output block
                else:
                    ib = j                           # read own block (block-diag)
                wp = wp.at[j * d_out:(j + 1) * d_out,
                           ib * d_in:(ib + 1) * d_in].set(w.T)
                biases.append(b)
            flat += [wp, jnp.concatenate(biases).reshape(-1, 1)]
        # Per-node LayerNorm chunk masks: m[k, f] = 1 iff feature f belongs to
        # node k.  msum = m / d gives per-chunk means; m.T broadcasts back.
        d_ln = int(nodes[0]["gamma"].shape[0])
        F = n_nodes * d_ln
        cid = jnp.arange(F) // d_ln
        m = (cid[None, :] == jnp.arange(n_nodes)[:, None]).astype(jnp.float32)
        flat += [m * (1.0 / d_ln),                               # (n_nodes, F)
                 m.T,                                            # (F, n_nodes)
                 jnp.concatenate([n["gamma"] for n in nodes]).reshape(-1, 1),
                 jnp.concatenate([n["beta"] for n in nodes]).reshape(-1, 1)]
    leaf_dim = int(levels[-1][0]["gamma"].shape[0])
    n_leaves = len(levels[-1])
    return {
        "flat": flat,
        "meta": tuple(meta),
        "leaf_dim": leaf_dim,
        "n_leaves": n_leaves,
        "out_width": n_leaves * leaf_dim,
    }


# ----------------------------------------------------------------------------
# Forward: single fused Pallas kernel for the whole tree
# ----------------------------------------------------------------------------
def patch_pipe_forward(packed, x):
    B, d_in = x.shape
    flat = packed["flat"]
    out_width = packed["out_width"]

    # Batch on the lane axis: feed x transposed, emit (out_width, B).
    x_t = x.T                                           # (d_in, B)

    # Batch tile (lane axis).  Whole batch in one step up to 256; for larger
    # batches use 128-multiple tiles (unmasked loads/stores) capped at 512 and
    # sized so there are >= 2 "parallel" grid steps (feeds both v7x TCs).
    if B <= 256:
        TB = B
    else:
        TB = min(512, ((pl.cdiv(B, 2) + 127) // 128) * 128)

    kernel = functools.partial(_fused_tree_kernel, packed["meta"])

    in_specs = [pl.BlockSpec((d_in, TB), lambda i: (0, i))]
    in_specs += [pl.BlockSpec(p.shape, lambda i: (0, 0)) for p in flat]

    # TODO(synk): if downstream tolerates bf16, stream x / the output in bf16
    # (halves the only HBM traffic); kept f32 here for exactness vs. reference.
    out_t = pl.pallas_call(
        kernel,
        out_shape=jax.ShapeDtypeStruct((out_width, B), jnp.float32),
        grid=(pl.cdiv(B, TB),),
        in_specs=in_specs,
        out_specs=pl.BlockSpec((out_width, TB), lambda i: (0, i)),
        compiler_params=pltpu.CompilerParams(
            dimension_semantics=("parallel",)),
    )(x_t, *flat)

    d = packed["leaf_dim"]
    return [out_t[j * d:(j + 1) * d, :].T for j in range(packed["n_leaves"])]


# ----------------------------------------------------------------------------
# Pure-JAX reference (per-node, unfused) for correctness checking
# ----------------------------------------------------------------------------
def _mlp_block_ref(x, linear_params, gamma, beta):
    h = x
    for w, b in linear_params:
        h = jnp.maximum(h @ w + b, 0.0)
    mean = jnp.mean(h, axis=-1, keepdims=True)
    var = jnp.mean((h - mean) ** 2, axis=-1, keepdims=True)
    return (h - mean) / jnp.sqrt(var + _LN_EPS) * gamma + beta


def patch_pipe_forward_ref(node, x):
    h = _mlp_block_ref(x, node["linears"], node["gamma"], node["beta"])
    out = []
    for child in node["children"]:
        out = out + patch_pipe_forward_ref(child, x=h)
    if len(out) == 0:
        return [h]
    return out


if __name__ == "__main__":
    # Root [32,16,16] -> 2 children [16,16,8] -> 4 leaves [8,8]
    # => 4 output tensors of shape (batch, 8), all from ONE pallas_call.
    sizes = [32, 16, 16, 16, 8, 8]
    sizes_pr_level = 3
    forks = [2, 2]
    batch = 8

    key = jax.random.PRNGKey(0)
    kparams, kx = jax.random.split(key)
    params = init_patch_pipe(kparams, sizes, sizes_pr_level, forks)
    packed = pack_patch_pipe(params)
    x = jax.random.normal(kx, (batch, sizes[0]), jnp.float32)

    outs = patch_pipe_forward(packed, x)        # single fused Pallas kernel
    outs = jax.block_until_ready(outs)

    refs = patch_pipe_forward_ref(params, x)    # unfused pure-JAX reference
    assert len(outs) == len(refs) == 4
    for o, r in zip(outs, refs):
        assert o.shape == r.shape
        assert jnp.allclose(o, r, atol=2e-5, rtol=2e-4), \
            float(jnp.max(jnp.abs(o - r)))

    print("KERNEL_OK")
</pallas_src>

<mosaic_0001>
module attributes {stable_mosaic.version = 11 : i64} {
  func.func @_fused_tree_kernel(%arg0: i32, %arg1: memref<32x8xf32, #tpu.memory_space<vmem>>, %arg2: memref<16x32xf32, #tpu.memory_space<vmem>>, %arg3: memref<16x1xf32, #tpu.memory_space<vmem>>, %arg4: memref<16x16xf32, #tpu.memory_space<vmem>>, %arg5: memref<16x1xf32, #tpu.memory_space<vmem>>, %arg6: memref<1x16xf32, #tpu.memory_space<vmem>>, %arg7: memref<16x1xf32, #tpu.memory_space<vmem>>, %arg8: memref<16x1xf32, #tpu.memory_space<vmem>>, %arg9: memref<16x1xf32, #tpu.memory_space<vmem>>, %arg10: memref<32x16xf32, #tpu.memory_space<vmem>>, %arg11: memref<32x1xf32, #tpu.memory_space<vmem>>, %arg12: memref<16x32xf32, #tpu.memory_space<vmem>>, %arg13: memref<16x1xf32, #tpu.memory_space<vmem>>, %arg14: memref<2x16xf32, #tpu.memory_space<vmem>>, %arg15: memref<16x2xf32, #tpu.memory_space<vmem>>, %arg16: memref<16x1xf32, #tpu.memory_space<vmem>>, %arg17: memref<16x1xf32, #tpu.memory_space<vmem>>, %arg18: memref<32x16xf32, #tpu.memory_space<vmem>>, %arg19: memref<32x1xf32, #tpu.memory_space<vmem>>, %arg20: memref<4x32xf32, #tpu.memory_space<vmem>>, %arg21: memref<32x4xf32, #tpu.memory_space<vmem>>, %arg22: memref<32x1xf32, #tpu.memory_space<vmem>>, %arg23: memref<32x1xf32, #tpu.memory_space<vmem>>, %arg24: memref<32x8xf32, #tpu.memory_space<vmem>>) attributes {dimension_semantics = [#tpu.dimension_semantics<parallel>], iteration_bounds = array<i64: 1>, scalar_prefetch = 0 : i64, scratch_operands = 0 : i64, tpu.core_type = #tpu.core_type<tc>, window_params = [{transform_indices = @transform_0, window_bounds = array<i64: 32, 8>}, {pipeline_mode = #tpu.pipeline_mode<synchronous>, transform_indices = @transform_1, window_bounds = array<i64: 16, 32>}, {pipeline_mode = #tpu.pipeline_mode<synchronous>, transform_indices = @transform_2, window_bounds = array<i64: 16, 1>}, {pipeline_mode = #tpu.pipeline_mode<synchronous>, transform_indices = @transform_3, window_bounds = array<i64: 16, 16>}, {pipeline_mode = #tpu.pipeline_mode<synchronous>, transform_indices = @transform_4, window_bounds = array<i64: 16, 1>}, {pipeline_mode = #tpu.pipeline_mode<synchronous>, transform_indices = @transform_5, window_bounds = array<i64: 1, 16>}, {pipeline_mode = #tpu.pipeline_mode<synchronous>, transform_indices = @transform_6, window_bounds = array<i64: 16, 1>}, {pipeline_mode = #tpu.pipeline_mode<synchronous>, transform_indices = @transform_7, window_bounds = array<i64: 16, 1>}, {pipeline_mode = #tpu.pipeline_mode<synchronous>, transform_indices = @transform_8, window_bounds = array<i64: 16, 1>}, {pipeline_mode = #tpu.pipeline_mode<synchronous>, transform_indices = @transform_9, window_bounds = array<i64: 32, 16>}, {pipeline_mode = #tpu.pipeline_mode<synchronous>, transform_indices = @transform_10, window_bounds = array<i64: 32, 1>}, {pipeline_mode = #tpu.pipeline_mode<synchronous>, transform_indices = @transform_11, window_bounds = array<i64: 16, 32>}, {pipeline_mode = #tpu.pipeline_mode<synchronous>, transform_indices = @transform_12, window_bounds = array<i64: 16, 1>}, {pipeline_mode = #tpu.pipeline_mode<synchronous>, transform_indices = @transform_13, window_bounds = array<i64: 2, 16>}, {pipeline_mode = #tpu.pipeline_mode<synchronous>, transform_indices = @transform_14, window_bounds = array<i64: 16, 2>}, {pipeline_mode = #tpu.pipeline_mode<synchronous>, transform_indices = @transform_15, window_bounds = array<i64: 16, 1>}, {pipeline_mode = #tpu.pipeline_mode<synchronous>, transform_indices = @transform_16, window_bounds = array<i64: 16, 1>}, {pipeline_mode = #tpu.pipeline_mode<synchronous>, transform_indices = @transform_17, window_bounds = array<i64: 32, 16>}, {pipeline_mode = #tpu.pipeline_mode<synchronous>, transform_indices = @transform_18, window_bounds = array<i64: 32, 1>}, {pipeline_mode = #tpu.pipeline_mode<synchronous>, transform_indices = @transform_19, window_bounds = array<i64: 4, 32>}, {pipeline_mode = #tpu.pipeline_mode<synchronous>, transform_indices = @transform_20, window_bounds = array<i64: 32, 4>}, {pipeline_mode = #tpu.pipeline_mode<synchronous>, transform_indices = @transform_21, window_bounds = array<i64: 32, 1>}, {pipeline_mode = #tpu.pipeline_mode<synchronous>, transform_indices = @transform_22, window_bounds = array<i64: 32, 1>}, {transform_indices = @transform_23, window_bounds = array<i64: 32, 8>}]} {
    %c0 = arith.constant 0 : index
    %c0_0 = arith.constant 0 : index
    %0 = vector.load %arg1[%c0, %c0_0] : memref<32x8xf32, #tpu.memory_space<vmem>>, vector<32x8xf32>
    %c0_1 = arith.constant 0 : index
    %c0_2 = arith.constant 0 : index
    %1 = vector.load %arg2[%c0_1, %c0_2] : memref<16x32xf32, #tpu.memory_space<vmem>>, vector<16x32xf32>
    %c0_3 = arith.constant 0 : index
    %c0_4 = arith.constant 0 : index
    %2 = vector.load %arg3[%c0_3, %c0_4] : memref<16x1xf32, #tpu.memory_space<vmem>>, vector<16x1xf32>
    %cst = arith.constant dense<0.000000e+00> : vector<16x8xf32>
    %3 = tpu.matmul %1, %0, %cst {dimension_numbers = #tpu.dot_dimension_numbers<[1], [0], [0], [1], [0, 0, 1, 1], [], []>} : vector<16x32xf32>, vector<32x8xf32>, vector<16x8xf32> -> vector<16x8xf32>
    %4 = vector.broadcast %2 : vector<16x1xf32> to vector<16x8xf32>
    %5 = arith.addf %3, %4 : vector<16x8xf32>
    %cst_5 = arith.constant 0.000000e+00 : f32
    %6 = vector.broadcast %cst_5 : f32 to vector<16x8xf32>
    %7 = arith.maximumf %5, %6 : vector<16x8xf32>
    %c0_6 = arith.constant 0 : index
    %c0_7 = arith.constant 0 : index
    %8 = vector.load %arg4[%c0_6, %c0_7] : memref<16x16xf32, #tpu.memory_space<vmem>>, vector<16x16xf32>
    %c0_8 = arith.constant 0 : index
    %c0_9 = arith.constant 0 : index
    %9 = vector.load %arg5[%c0_8, %c0_9] : memref<16x1xf32, #tpu.memory_space<vmem>>, vector<16x1xf32>
    %cst_10 = arith.constant dense<0.000000e+00> : vector<16x8xf32>
    %10 = tpu.matmul %8, %7, %cst_10 {dimension_numbers = #tpu.dot_dimension_numbers<[1], [0], [0], [1], [0, 0, 1, 1], [], []>} : vector<16x16xf32>, vector<16x8xf32>, vector<16x8xf32> -> vector<16x8xf32>
    %11 = vector.broadcast %9 : vector<16x1xf32> to vector<16x8xf32>
    %12 = arith.addf %10, %11 : vector<16x8xf32>
    %cst_11 = arith.constant 0.000000e+00 : f32
    %13 = vector.broadcast %cst_11 : f32 to vector<16x8xf32>
    %14 = arith.maximumf %12, %13 : vector<16x8xf32>
    %c0_12 = arith.constant 0 : index
    %c0_13 = arith.constant 0 : index
    %15 = vector.load %arg6[%c0_12, %c0_13] : memref<1x16xf32, #tpu.memory_space<vmem>>, vector<1x16xf32>
    %c0_14 = arith.constant 0 : index
    %c0_15 = arith.constant 0 : index
    %16 = vector.load %arg7[%c0_14, %c0_15] : memref<16x1xf32, #tpu.memory_space<vmem>>, vector<16x1xf32>
    %c0_16 = arith.constant 0 : index
    %c0_17 = arith.constant 0 : index
    %17 = vector.load %arg8[%c0_16, %c0_17] : memref<16x1xf32, #tpu.memory_space<vmem>>, vector<16x1xf32>
    %c0_18 = arith.constant 0 : index
    %c0_19 = arith.constant 0 : index
    %18 = vector.load %arg9[%c0_18, %c0_19] : memref<16x1xf32, #tpu.memory_space<vmem>>, vector<16x1xf32>
    %cst_20 = arith.constant dense<0.000000e+00> : vector<1x8xf32>
    %19 = tpu.matmul %15, %14, %cst_20 {dimension_numbers = #tpu.dot_dimension_numbers<[1], [0], [0], [1], [0, 0, 1, 1], [], []>} : vector<1x16xf32>, vector<16x8xf32>, vector<1x8xf32> -> vector<1x8xf32>
    %cst_21 = arith.constant dense<0.000000e+00> : vector<16x8xf32>
    %20 = tpu.matmul %16, %19, %cst_21 {dimension_numbers = #tpu.dot_dimension_numbers<[1], [0], [0], [1], [0, 0, 1, 1], [], []>} : vector<16x1xf32>, vector<1x8xf32>, vector<16x8xf32> -> vector<16x8xf32>
    %21 = arith.subf %14, %20 : vector<16x8xf32>
    %22 = arith.mulf %21, %21 : vector<16x8xf32>
    %cst_22 = arith.constant dense<0.000000e+00> : vector<1x8xf32>
    %23 = tpu.matmul %15, %22, %cst_22 {dimension_numbers = #tpu.dot_dimension_numbers<[1], [0], [0], [1], [0, 0, 1, 1], [], []>} : vector<1x16xf32>, vector<16x8xf32>, vector<1x8xf32> -> vector<1x8xf32>
    %cst_23 = arith.constant dense<0.000000e+00> : vector<16x8xf32>
    %24 = tpu.matmul %16, %23, %cst_23 {dimension_numbers = #tpu.dot_dimension_numbers<[1], [0], [0], [1], [0, 0, 1, 1], [], []>} : vector<16x1xf32>, vector<1x8xf32>, vector<16x8xf32> -> vector<16x8xf32>
    %cst_24 = arith.constant 9.99999974E-6 : f32
    %25 = vector.broadcast %cst_24 : f32 to vector<16x8xf32>
    %26 = arith.addf %24, %25 : vector<16x8xf32>
    %27 = math.rsqrt %26 : vector<16x8xf32>
    %28 = arith.mulf %21, %27 : vector<16x8xf32>
    %29 = vector.broadcast %17 : vector<16x1xf32> to vector<16x8xf32>
    %30 = arith.mulf %28, %29 : vector<16x8xf32>
    %31 = vector.broadcast %18 : vector<16x1xf32> to vector<16x8xf32>
    %32 = arith.addf %30, %31 : vector<16x8xf32>
    %c0_25 = arith.constant 0 : index
    %c0_26 = arith.constant 0 : index
    %33 = vector.load %arg10[%c0_25, %c0_26] : memref<32x16xf32, #tpu.memory_space<vmem>>, vector<32x16xf32>
    %c0_27 = arith.constant 0 : index
    %c0_28 = arith.constant 0 : index
    %34 = vector.load %arg11[%c0_27, %c0_28] : memref<32x1xf32, #tpu.memory_space<vmem>>, vector<32x1xf32>
    %cst_29 = arith.constant dense<0.000000e+00> : vector<32x8xf32>
    %35 = tpu.matmul %33, %32, %cst_29 {dimension_numbers = #tpu.dot_dimension_numbers<[1], [0], [0], [1], [0, 0, 1, 1], [], []>} : vector<32x16xf32>, vector<16x8xf32>, vector<32x8xf32> -> vector<32x8xf32>
    %36 = vector.broadcast %34 : vector<32x1xf32> to vector<32x8xf32>
    %37 = arith.addf %35, %36 : vector<32x8xf32>
    %cst_30 = arith.constant 0.000000e+00 : f32
    %38 = vector.broadcast %cst_30 : f32 to vector<32x8xf32>
    %39 = arith.maximumf %37, %38 : vector<32x8xf32>
    %c0_31 = arith.constant 0 : index
    %c0_32 = arith.constant 0 : index
    %40 = vector.load %arg12[%c0_31, %c0_32] : memref<16x32xf32, #tpu.memory_space<vmem>>, vector<16x32xf32>
    %c0_33 = arith.constant 0 : index
    %c0_34 = arith.constant 0 : index
    %41 = vector.load %arg13[%c0_33, %c0_34] : memref<16x1xf32, #tpu.memory_space<vmem>>, vector<16x1xf32>
    %cst_35 = arith.constant dense<0.000000e+00> : vector<16x8xf32>
    %42 = tpu.matmul %40, %39, %cst_35 {dimension_numbers = #tpu.dot_dimension_numbers<[1], [0], [0], [1], [0, 0, 1, 1], [], []>} : vector<16x32xf32>, vector<32x8xf32>, vector<16x8xf32> -> vector<16x8xf32>
    %43 = vector.broadcast %41 : vector<16x1xf32> to vector<16x8xf32>
    %44 = arith.addf %42, %43 : vector<16x8xf32>
    %cst_36 = arith.constant 0.000000e+00 : f32
    %45 = vector.broadcast %cst_36 : f32 to vector<16x8xf32>
    %46 = arith.maximumf %44, %45 : vector<16x8xf32>
    %c0_37 = arith.constant 0 : index
    %c0_38 = arith.constant 0 : index
    %47 = vector.load %arg14[%c0_37, %c0_38] : memref<2x16xf32, #tpu.memory_space<vmem>>, vector<2x16xf32>
    %c0_39 = arith.constant 0 : index
    %c0_40 = arith.constant 0 : index
    %48 = vector.load %arg15[%c0_39, %c0_40] : memref<16x2xf32, #tpu.memory_space<vmem>>, vector<16x2xf32>
    %c0_41 = arith.constant 0 : index
    %c0_42 = arith.constant 0 : index
    %49 = vector.load %arg16[%c0_41, %c0_42] : memref<16x1xf32, #tpu.memory_space<vmem>>, vector<16x1xf32>
    %c0_43 = arith.constant 0 : index
    %c0_44 = arith.constant 0 : index
    %50 = vector.load %arg17[%c0_43, %c0_44] : memref<16x1xf32, #tpu.memory_space<vmem>>, vector<16x1xf32>
    %cst_45 = arith.constant dense<0.000000e+00> : vector<2x8xf32>
    %51 = tpu.matmul %47, %46, %cst_45 {dimension_numbers = #tpu.dot_dimension_numbers<[1], [0], [0], [1], [0, 0, 1, 1], [], []>} : vector<2x16xf32>, vector<16x8xf32>, vector<2x8xf32> -> vector<2x8xf32>
    %cst_46 = arith.constant dense<0.000000e+00> : vector<16x8xf32>
    %52 = tpu.matmul %48, %51, %cst_46 {dimension_numbers = #tpu.dot_dimension_numbers<[1], [0], [0], [1], [0, 0, 1, 1], [], []>} : vector<16x2xf32>, vector<2x8xf32>, vector<16x8xf32> -> vector<16x8xf32>
    %53 = arith.subf %46, %52 : vector<16x8xf32>
    %54 = arith.mulf %53, %53 : vector<16x8xf32>
    %cst_47 = arith.constant dense<0.000000e+00> : vector<2x8xf32>
    %55 = tpu.matmul %47, %54, %cst_47 {dimension_numbers = #tpu.dot_dimension_numbers<[1], [0], [0], [1], [0, 0, 1, 1], [], []>} : vector<2x16xf32>, vector<16x8xf32>, vector<2x8xf32> -> vector<2x8xf32>
    %cst_48 = arith.constant dense<0.000000e+00> : vector<16x8xf32>
    %56 = tpu.matmul %48, %55, %cst_48 {dimension_numbers = #tpu.dot_dimension_numbers<[1], [0], [0], [1], [0, 0, 1, 1], [], []>} : vector<16x2xf32>, vector<2x8xf32>, vector<16x8xf32> -> vector<16x8xf32>
    %cst_49 = arith.constant 9.99999974E-6 : f32
    %57 = vector.broadcast %cst_49 : f32 to vector<16x8xf32>
    %58 = arith.addf %56, %57 : vector<16x8xf32>
    %59 = math.rsqrt %58 : vector<16x8xf32>
    %60 = arith.mulf %53, %59 : vector<16x8xf32>
    %61 = vector.broadcast %49 : vector<16x1xf32> to vector<16x8xf32>
    %62 = arith.mulf %60, %61 : vector<16x8xf32>
    %63 = vector.broadcast %50 : vector<16x1xf32> to vector<16x8xf32>
    %64 = arith.addf %62, %63 : vector<16x8xf32>
    %c0_50 = arith.constant 0 : index
    %c0_51 = arith.constant 0 : index
    %65 = vector.load %arg18[%c0_50, %c0_51] : memref<32x16xf32, #tpu.memory_space<vmem>>, vector<32x16xf32>
    %c0_52 = arith.constant 0 : index
    %c0_53 = arith.constant 0 : index
    %66 = vector.load %arg19[%c0_52, %c0_53] : memref<32x1xf32, #tpu.memory_space<vmem>>, vector<32x1xf32>
    %cst_54 = arith.constant dense<0.000000e+00> : vector<32x8xf32>
    %67 = tpu.matmul %65, %64, %cst_54 {dimension_numbers = #tpu.dot_dimension_numbers<[1], [0], [0], [1], [0, 0, 1, 1], [], []>} : vector<32x16xf32>, vector<16x8xf32>, vector<32x8xf32> -> vector<32x8xf32>
    %68 = vector.broadcast %66 : vector<32x1xf32> to vector<32x8xf32>
    %69 = arith.addf %67, %68 : vector<32x8xf32>
    %cst_55 = arith.constant 0.000000e+00 : f32
    %70 = vector.broadcast %cst_55 : f32 to vector<32x8xf32>
    %71 = arith.maximumf %69, %70 : vector<32x8xf32>
    %c0_56 = arith.constant 0 : index
    %c0_57 = arith.constant 0 : index
    %72 = vector.load %arg20[%c0_56, %c0_57] : memref<4x32xf32, #tpu.memory_space<vmem>>, vector<4x32xf32>
    %c0_58 = arith.constant 0 : index
    %c0_59 = arith.constant 0 : index
    %73 = vector.load %arg21[%c0_58, %c0_59] : memref<32x4xf32, #tpu.memory_space<vmem>>, vector<32x4xf32>
    %c0_60 = arith.constant 0 : index
    %c0_61 = arith.constant 0 : index
    %74 = vector.load %arg22[%c0_60, %c0_61] : memref<32x1xf32, #tpu.memory_space<vmem>>, vector<32x1xf32>
    %c0_62 = arith.constant 0 : index
    %c0_63 = arith.constant 0 : index
    %75 = vector.load %arg23[%c0_62, %c0_63] : memref<32x1xf32, #tpu.memory_space<vmem>>, vector<32x1xf32>
    %cst_64 = arith.constant dense<0.000000e+00> : vector<4x8xf32>
    %76 = tpu.matmul %72, %71, %cst_64 {dimension_numbers = #tpu.dot_dimension_numbers<[1], [0], [0], [1], [0, 0, 1, 1], [], []>} : vector<4x32xf32>, vector<32x8xf32>, vector<4x8xf32> -> vector<4x8xf32>
    %cst_65 = arith.constant dense<0.000000e+00> : vector<32x8xf32>
    %77 = tpu.matmul %73, %76, %cst_65 {dimension_numbers = #tpu.dot_dimension_numbers<[1], [0], [0], [1], [0, 0, 1, 1], [], []>} : vector<32x4xf32>, vector<4x8xf32>, vector<32x8xf32> -> vector<32x8xf32>
    %78 = arith.subf %71, %77 : vector<32x8xf32>
    %79 = arith.mulf %78, %78 : vector<32x8xf32>
    %cst_66 = arith.constant dense<0.000000e+00> : vector<4x8xf32>
    %80 = tpu.matmul %72, %79, %cst_66 {dimension_numbers = #tpu.dot_dimension_numbers<[1], [0], [0], [1], [0, 0, 1, 1], [], []>} : vector<4x32xf32>, vector<32x8xf32>, vector<4x8xf32> -> vector<4x8xf32>
    %cst_67 = arith.constant dense<0.000000e+00> : vector<32x8xf32>
    %81 = tpu.matmul %73, %80, %cst_67 {dimension_numbers = #tpu.dot_dimension_numbers<[1], [0], [0], [1], [0, 0, 1, 1], [], []>} : vector<32x4xf32>, vector<4x8xf32>, vector<32x8xf32> -> vector<32x8xf32>
    %cst_68 = arith.constant 9.99999974E-6 : f32
    %82 = vector.broadcast %cst_68 : f32 to vector<32x8xf32>
    %83 = arith.addf %81, %82 : vector<32x8xf32>
    %84 = math.rsqrt %83 : vector<32x8xf32>
    %85 = arith.mulf %78, %84 : vector<32x8xf32>
    %86 = vector.broadcast %74 : vector<32x1xf32> to vector<32x8xf32>
    %87 = arith.mulf %85, %86 : vector<32x8xf32>
    %88 = vector.broadcast %75 : vector<32x1xf32> to vector<32x8xf32>
    %89 = arith.addf %87, %88 : vector<32x8xf32>
    %c0_69 = arith.constant 0 : index
    %c0_70 = arith.constant 0 : index
    %90 = vector.load %arg24[%c0_69, %c0_70] : memref<32x8xf32, #tpu.memory_space<vmem>>, vector<32x8xf32>
    tpu.vector_store %arg24[%c0_69, %c0_70], %89 {strides = array<i32>} : memref<32x8xf32, #tpu.memory_space<vmem>>, vector<32x8xf32>,
    return
  }
  func.func @transform_0(%arg0: i32) -> (i32, i32) {
    %c0_i32 = arith.constant 0 : i32
    %c0_i32_0 = arith.constant 0 : i32
    return %c0_i32, %arg0 : i32, i32
  }
  func.func @transform_1(%arg0: i32) -> (i32, i32) {
    %c0_i32 = arith.constant 0 : i32
    %c0_i32_0 = arith.constant 0 : i32
    %c0_i32_1 = arith.constant 0 : i32
    return %c0_i32, %c0_i32_0 : i32, i32
  }
  func.func @transform_2(%arg0: i32) -> (i32, i32) {
    %c0_i32 = arith.constant 0 : i32
    %c0_i32_0 = arith.constant 0 : i32
    %c0_i32_1 = arith.constant 0 : i32
    return %c0_i32, %c0_i32_0 : i32, i32
  }
  func.func @transform_3(%arg0: i32) -> (i32, i32) {
    %c0_i32 = arith.constant 0 : i32
    %c0_i32_0 = arith.constant 0 : i32
    %c0_i32_1 = arith.constant 0 : i32
    return %c0_i32, %c0_i32_0 : i32, i32
  }
  func.func @transform_4(%arg0: i32) -> (i32, i32) {
    %c0_i32 = arith.constant 0 : i32
    %c0_i32_0 = arith.constant 0 : i32
    %c0_i32_1 = arith.constant 0 : i32
    return %c0_i32, %c0_i32_0 : i32, i32
  }
  func.func @transform_5(%arg0: i32) -> (i32, i32) {
    %c0_i32 = arith.constant 0 : i32
    %c0_i32_0 = arith.constant 0 : i32
    %c0_i32_1 = arith.constant 0 : i32
    return %c0_i32, %c0_i32_0 : i32, i32
  }
  func.func @transform_6(%arg0: i32) -> (i32, i32) {
    %c0_i32 = arith.constant 0 : i32
    %c0_i32_0 = arith.constant 0 : i32
    %c0_i32_1 = arith.constant 0 : i32
    return %c0_i32, %c0_i32_0 : i32, i32
  }
  func.func @transform_7(%arg0: i32) -> (i32, i32) {
    %c0_i32 = arith.constant 0 : i32
    %c0_i32_0 = arith.constant 0 : i32
    %c0_i32_1 = arith.constant 0 : i32
    return %c0_i32, %c0_i32_0 : i32, i32
  }
  func.func @transform_8(%arg0: i32) -> (i32, i32) {
    %c0_i32 = arith.constant 0 : i32
    %c0_i32_0 = arith.constant 0 : i32
    %c0_i32_1 = arith.constant 0 : i32
    return %c0_i32, %c0_i32_0 : i32, i32
  }
  func.func @transform_9(%arg0: i32) -> (i32, i32) {
    %c0_i32 = arith.constant 0 : i32
    %c0_i32_0 = arith.constant 0 : i32
    %c0_i32_1 = arith.constant 0 : i32
    return %c0_i32, %c0_i32_0 : i32, i32
  }
  func.func @transform_10(%arg0: i32) -> (i32, i32) {
    %c0_i32 = arith.constant 0 : i32
    %c0_i32_0 = arith.constant 0 : i32
    %c0_i32_1 = arith.constant 0 : i32
    return %c0_i32, %c0_i32_0 : i32, i32
  }
  func.func @transform_11(%arg0: i32) -> (i32, i32) {
    %c0_i32 = arith.constant 0 : i32
    %c0_i32_0 = arith.constant 0 : i32
    %c0_i32_1 = arith.constant 0 : i32
    return %c0_i32, %c0_i32_0 : i32, i32
  }
  func.func @transform_12(%arg0: i32) -> (i32, i32) {
    %c0_i32 = arith.constant 0 : i32
    %c0_i32_0 = arith.constant 0 : i32
    %c0_i32_1 = arith.constant 0 : i32
    return %c0_i32, %c0_i32_0 : i32, i32
  }
  func.func @transform_13(%arg0: i32) -> (i32, i32) {
    %c0_i32 = arith.constant 0 : i32
    %c0_i32_0 = arith.constant 0 : i32
    %c0_i32_1 = arith.constant 0 : i32
    return %c0_i32, %c0_i32_0 : i32, i32
  }
  func.func @transform_14(%arg0: i32) -> (i32, i32) {
    %c0_i32 = arith.constant 0 : i32
    %c0_i32_0 = arith.constant 0 : i32
    %c0_i32_1 = arith.constant 0 : i32
    return %c0_i32, %c0_i32_0 : i32, i32
  }
  func.func @transform_15(%arg0: i32) -> (i32, i32) {
    %c0_i32 = arith.constant 0 : i32
    %c0_i32_0 = arith.constant 0 : i32
    %c0_i32_1 = arith.constant 0 : i32
    return %c0_i32, %c0_i32_0 : i32, i32
  }
  func.func @transform_16(%arg0: i32) -> (i32, i32) {
    %c0_i32 = arith.constant 0 : i32
    %c0_i32_0 = arith.constant 0 : i32
    %c0_i32_1 = arith.constant 0 : i32
    return %c0_i32, %c0_i32_0 : i32, i32
  }
  func.func @transform_17(%arg0: i32) -> (i32, i32) {
    %c0_i32 = arith.constant 0 : i32
    %c0_i32_0 = arith.constant 0 : i32
    %c0_i32_1 = arith.constant 0 : i32
    return %c0_i32, %c0_i32_0 : i32, i32
  }
  func.func @transform_18(%arg0: i32) -> (i32, i32) {
    %c0_i32 = arith.constant 0 : i32
    %c0_i32_0 = arith.constant 0 : i32
    %c0_i32_1 = arith.constant 0 : i32
    return %c0_i32, %c0_i32_0 : i32, i32
  }
  func.func @transform_19(%arg0: i32) -> (i32, i32) {
    %c0_i32 = arith.constant 0 : i32
    %c0_i32_0 = arith.constant 0 : i32
    %c0_i32_1 = arith.constant 0 : i32
    return %c0_i32, %c0_i32_0 : i32, i32
  }
  func.func @transform_20(%arg0: i32) -> (i32, i32) {
    %c0_i32 = arith.constant 0 : i32
    %c0_i32_0 = arith.constant 0 : i32
    %c0_i32_1 = arith.constant 0 : i32
    return %c0_i32, %c0_i32_0 : i32, i32
  }
  func.func @transform_21(%arg0: i32) -> (i32, i32) {
    %c0_i32 = arith.constant 0 : i32
    %c0_i32_0 = arith.constant 0 : i32
    %c0_i32_1 = arith.constant 0 : i32
    return %c0_i32, %c0_i32_0 : i32, i32
  }
  func.func @transform_22(%arg0: i32) -> (i32, i32) {
    %c0_i32 = arith.constant 0 : i32
    %c0_i32_0 = arith.constant 0 : i32
    %c0_i32_1 = arith.constant 0 : i32
    return %c0_i32, %c0_i32_0 : i32, i32
  }
  func.func @transform_23(%arg0: i32) -> (i32, i32) {
    %c0_i32 = arith.constant 0 : i32
    %c0_i32_0 = arith.constant 0 : i32
    return %c0_i32, %arg0 : i32, i32
  }
}

</mosaic_0001>

<bundles_post_ra>
// kernel: tpu_custom_call.1
= control target key start
LH: loop header
LB: loop body
LE: loop exit
PB: predicated region body
PF: predicated region fallthrough
CT: control target
= control target key end

     0   :  { %v988_v0 = vmov 0   ;;  %vm92_vm0 = vcmask 261120   ;;  %vm138_vm1 = vcmask 130048   ;;  %vm207_vm2 = vcmask 1040384   ;;  %s1354_s2 = inlined_call_operand.vmem [shape: f32[16,1], index: 2, kind: input, shape index: {}]   ;;  %s1355_s0 = inlined_call_operand.vmem [shape: f32[32,8], index: 0, kind: input, shape index: {}]   ;;  %s1356_s1 = inlined_call_operand.vmem [shape: f32[16,32], index: 1, kind: input, shape index: {}]   ;;  %s1357_s8 = inlined_call_operand.vmem [shape: f32[16,1], index: 8, kind: input, shape index: {}]   ;;  %s1358_s10 = inlined_call_operand.vmem [shape: f32[32,1], index: 10, kind: input, shape index: {}]   ;;  %s1359_s12 = inlined_call_operand.vmem [shape: f32[16,1], index: 12, kind: input, shape index: {}]   ;;  %s1360_s15 = inlined_call_operand.vmem [shape: f32[16,1], index: 15, kind: input, shape index: {}]   ;;  %s1361_s4 = inlined_call_operand.vmem [shape: f32[16,1], index: 4, kind: input, shape index: {}]   ;;  %s1362_s18 = inlined_call_operand.vmem [shape: f32[32,1], index: 18, kind: input, shape index: {}]   ;;  %s1363_s21 = inlined_call_operand.vmem [shape: f32[32,1], index: 21, kind: input, shape index: {}]   ;;  %s1364_s22 = inlined_call_operand.vmem [shape: f32[32,1], index: 22, kind: input, shape index: {}]   ;;  %s1365_s16 = inlined_call_operand.vmem [shape: f32[16,1], index: 16, kind: input, shape index: {}]   ;;  %s1366_s3 = inlined_call_operand.vmem [shape: f32[16,16], index: 3, kind: input, shape index: {}]   ;;  %s1367_s5 = inlined_call_operand.vmem [shape: f32[1,16], index: 5, kind: input, shape index: {}]   ;;  %s1368_s6 = inlined_call_operand.vmem [shape: f32[16,1], index: 6, kind: input, shape index: {}]   ;;  %s1369_s7 = inlined_call_operand.vmem [shape: f32[16,1], index: 7, kind: input, shape index: {}]   ;;  %s1370_s9 = inlined_call_operand.vmem [shape: f32[32,16], index: 9, kind: input, shape index: {}]   ;;  %s1371_s11 = inlined_call_operand.vmem [shape: f32[16,32], index: 11, kind: input, shape index: {}]   ;;  %s1372_s13 = inlined_call_operand.vmem [shape: f32[2,16], index: 13, kind: input, shape index: {}]   ;;  %s1373_s14 = inlined_call_operand.vmem [shape: f32[16,2], index: 14, kind: input, shape index: {}]   ;;  %s1374_s17 = inlined_call_operand.vmem [shape: f32[32,16], index: 17, kind: input, shape index: {}]   ;;  %s1375_s19 = inlined_call_operand.vmem [shape: f32[4,32], index: 19, kind: input, shape index: {}]   ;;  %s1376_s20 = inlined_call_operand.vmem [shape: f32[32,4], index: 20, kind: input, shape index: {}]   ;;  %s1377_s23 = inlined_call_operand.vmem [shape: f32[32,8], index: 23, kind: output, shape index: {}]  }
   0x1   :  { %1386 = sst [smem:[#allocation2_spill]] %s1354_s2  ;;  %969 = vset.pattern.permute.xlu0 %v988_v0  ;;  %970 = vset.pattern.permute.xlu1 %v988_v0  ;;  %v615_v14 = vld [vmem:[%s1362_s18 + $0x18] sm:$0xff]  ;;  %v612_v16 = vld [vmem:[%s1362_s18] sm:$0xff]  ;;  %v688_v18 = vld [vmem:[%s1363_s21 + $0x10] sm:$0xff]  ;;  %vm200_vm3 = vcmask 7168   ;;  %vm485_vm10 = vcmask 1041408  }
   0x2   :  { %1387 = sst [smem:[#allocation3_spill]] %s1355_s0  ;;  %971 = vset.pattern.permute.xlu2 %v988_v0  ;;  %v691_v20 = vld [vmem:[%s1364_s22 + $0x8] sm:$0xff]  ;;  %v614_v23 = vld [vmem:[%s1362_s18 + $0x10] sm:$0xff]  ;;  %v686_v24 = vld [vmem:[%s1363_s21] sm:$0xff]  ;;  %vm478_vm11 = vcmask 15360  }
   0x3   :  { %1388 = sst [smem:[#allocation4_spill]] %s1356_s1  ;;  %v454_v22 = vld [vmem:[%s1365_s16 + $0x8] sm:$0xff]  ;;  %v689_v25 = vld [vmem:[%s1363_s21 + $0x18] sm:$0xff]  ;;  %v692_v26 = vld [vmem:[%s1364_s22 + $0x10] sm:$0xff] }
   0x4   :  { %1389 = sst [smem:[#allocation5_spill]] %s1357_s8  ;;  %v124_v35 = vld [vmem:[%s1366_s3] sm:$0xff]  ;;  %v125_v36 = vld [vmem:[%s1366_s3 + $0x8] sm:$0xff] }
   0x5   :  { %1390 = sst [smem:[#allocation6_spill]] %s1358_s10  ;;  %v170_v45 = vld [vmem:[%s1367_s5] sm:$0x1]  ;;  %v172_v48 = vld [vmem:[%s1368_s6 + $0x8] sm:$0xff] }
   0x6   :  { %1391 = sst [smem:[#allocation7_spill]] %s1359_s12  ;;  %v171_v46 = vld [vmem:[%s1368_s6] sm:$0xff]  ;;  %v174_v49 = vld [vmem:[%s1369_s7 + $0x8] sm:$0xff] }
   0x7   :  { %1392 = sst [smem:[#allocation8_spill]] %s1360_s15  ;;  %313 = vperm.xlu2 %971, %v174_v49   ;;  %v173_v56 = vld [vmem:[%s1369_s7] sm:$0xff]  ;;  %v613_v62 = vld [vmem:[%s1362_s18 + $0x8] sm:$0xff] }
   0x8   :  { %1393 = sst [smem:[#allocation9_spill]] %s1361_s4  ;;  %v453_v61 = vld [vmem:[%s1365_s16] sm:$0xff]  ;;  %v687_v63 = vld [vmem:[%s1363_s21 + $0x8] sm:$0xff] }
   0x9   :  { %s1394_s24 = sld [smem:[#allocation2_spill]]  ;;  %v690_v0 = vld [vmem:[%s1364_s22] sm:$0xff] }
   0xa   :  { %s1395_s0 = sld [smem:[#allocation3_spill]] }
   0xb   :  { %s1396_s2 = sld [smem:[#allocation4_spill]] }
   0xc   :  { %s1397_s1 = sld [smem:[#allocation5_spill]] }
   0xd   :  { %s1398_s4 = sld [smem:[#allocation6_spill]] }
   0xe   :  { %s1399_s29 = sld [smem:[#allocation7_spill]] }
   0xf   :  { %v81_v1 = vld [vmem:[%s1394_s24 + $0x8] sm:$0xff]  ;;  %v80_v7 = vld [vmem:[%s1394_s24] sm:$0xff]  ;;  %s1401_s12 = sld [smem:[#allocation9_spill]]  ;;  %308 = vperm.xlu2 %971, %v173_v56  }
  0x10   :  { %v77_v2 = vld [vmem:[%s1395_s0 + $0x18] sm:$0xff]  ;;  %v76_v3 = vld [vmem:[%s1395_s0 + $0x10] sm:$0xff]  ;;  %89 = vperm.xlu0 %969, %v81_v1   ;;  %v75_v4 = vld [vmem:[%s1395_s0 + $0x8] sm:$0xff] }
  0x11   :  { %111 = vmatpush.msra.mxu0 %v77_v2  ;;  %v74_v5 = vld [vmem:[%s1395_s0] sm:$0xff]  ;;  %v79_v8 = vld [vmem:[%s1396_s2 + $0x8] sm:$0xff]  ;;  %v693_v1 = vld [vmem:[%s1364_s22 + $0x18] sm:$0xff] }
  0x12   :  { %v78_v6 = vld [vmem:[%s1396_s2] sm:$0xff]  ;;  %v176_v9 = vld [vmem:[%s1397_s1 + $0x8] sm:$0xff]  ;;  %s1400_s2 = sld [smem:[#allocation8_spill]] }
  0x13   :  { %112 = vmatpush.msra.mxu0 %v76_v3  ;;  %v336_v10 = vld [vmem:[%s1398_s4 + $0x10] sm:$0xff]  ;;  %v175_v17 = vld [vmem:[%s1397_s1] sm:$0xff]  ;;  %v335_v19 = vld [vmem:[%s1398_s4 + $0x8] sm:$0xff] }
  0x14   :  { %v406_v11 = vld [vmem:[%s1399_s29 + $0x8] sm:$0xff]  ;;  %v405_v21 = vld [vmem:[%s1399_s29] sm:$0xff]  ;;  %v337_v57 = vld [vmem:[%s1398_s4 + $0x18] sm:$0xff] }
  0x15   :  { %113 = vmatpush.msra.mxu0 %v75_v4  ;;  %v127_v13 = vld [vmem:[%s1401_s12 + $0x8] sm:$0xff]  ;;  %v126_v15 = vld [vmem:[%s1401_s12] sm:$0xff] }
  0x16   :  { %135 = vperm.xlu1 %970, %v127_v13   ;;  %v334_v58 = vld [vmem:[%s1398_s4] sm:$0xff] }
  0x17   :  { %114 = vmatpush.msra.mxu0 %v74_v5  ;;  %355 = vperm.xlu2 %971, %v337_v57  }
  0x18   :  { %924 = vmatmul.msk.f32.vlgmr.msra.gmra.mxu0 %vm92_vm0, %v78_v6  ;;  %84 = vperm.xlu0 %969, %v80_v7   ;;  %v451_v12 = vld [vmem:[%s1400_s2] sm:$0xff]  ;;  %v452_v59 = vld [vmem:[%s1400_s2 + $0x8] sm:$0xff] }
  0x1e   :  { %130 = vperm.xlu1 %970, %v126_v15  }
  0x1f   :  { %340 = vperm.xlu2 %971, %v334_v58  }
  0x20   :  { %925 = vmatmul.msk.f32.gmra.mxu0 %vm92_vm0, %v79_v8  ;;  %325 = vperm.xlu0 %969, %v176_v9  }
  0x26   :  { %320 = vperm.xlu1 %970, %v175_v17  }
  0x27   :  { %591 = vperm.xlu2 %971, %v452_v59  }
  0x28   :  { %350 = vperm.xlu0 %969, %v336_v10  }
  0x2e   :  { %345 = vperm.xlu1 %970, %v335_v19  }
  0x2f   :  { %598 = vperm.xlu2 %971, %v453_v61   ;;  %v449_v61 = vld [vmem:[%s1373_s14] sm:$0xff] }
  0x30   :  { %414 = vperm.xlu0 %969, %v406_v11  }
  0x36   :  { %409 = vperm.xlu1 %970, %v405_v21  }
  0x37   :  { %623 = vperm.xlu2 %971, %v613_v62  }
  0x38   :  { %586 = vperm.xlu0 %969, %v451_v12  }
  0x3e   :  { %603 = vperm.xlu1 %970, %v454_v22  }
  0x3f   :  { %874 = vperm.xlu2 %971, %v687_v63   ;;  %v450_v63 = vld [vmem:[%s1373_s14 + $0x8] sm:$0xff] }
  0x40   :  { %633 = vperm.xlu0 %969, %v615_v14  }
  0x46   :  { %628 = vperm.xlu1 %970, %v614_v23  }
  0x47   :  { %893 = vperm.xlu2 %971, %v690_v0  }
  0x48   :  { %618 = vperm.xlu0 %969, %v612_v16  }
  0x4e   :  { %869 = vperm.xlu1 %970, %v686_v24  }
  0x4f   :  { %908 = vperm.xlu2 %971, %v693_v1  }
  0x50   :  { %879 = vperm.xlu0 %969, %v688_v18  }
  0x56   :  { %884 = vperm.xlu1 %970, %v689_v25  }
  0x58   :  { %898 = vperm.xlu0 %969, %v691_v20  }
  0x5e   :  { %903 = vperm.xlu1 %970, %v692_v26  }
  0x61   :  { %v314_v13 = vpop.permute.xlu2 %313 }
  0x69   :  { %v309_v23 = vpop.permute.xlu2 %308 }
  0x82   :  { %v90_v27 = vpop.permute.xlu0 %89 }
  0x88   :  { %v136_v37 = vpop.permute.xlu1 %135 }
  0x8a   :  { %v85_v29 = vpop.permute.xlu0 %84 }
  0x90   :  { %v131_v38 = vpop.permute.xlu1 %130 }
  0x92   :  { %v326_v26 = vpop.permute.xlu0 %325 }
  0x95   :  { %v116_v28 = vpop.f32.mrf.mxu0 }
  0x96   :  { %v117_v31 = vadd.f32 %v116_v28, %v85_v29 }
  0x98   :  { %v122_v34 = vmax.f32 %v117_v31, 0.0  ;;  %v321_v28 = vpop.permute.xlu1 %320  ;;  %v331_v31 = vld [vmem:[%s1370_s9 + $0x8] sm:$0xff] }
  0x9d   :  { %v119_v30 = vpop.f32.mrf.mxu0 }
  0x9e   :  { %v120_v32 = vadd.f32 %v119_v30, %v90_v27  ;;  %v330_v30 = vld [vmem:[%s1370_s9] sm:$0xff] }
  0xa0   :  { %v123_v33 = vmax.f32 %v120_v32, 0.0  ;;  %v332_v32 = vld [vmem:[%s1370_s9 + $0x10] sm:$0xff] }
  0xa2   :  { %159 = vmatpush.msrb.mxu0 %v123_v33  ;;  %966 = vmatpush.msra.mxu1 %v123_v33  ;;  %v333_v33 = vld [vmem:[%s1370_s9 + $0x18] sm:$0xff] }
  0xa4   :  { %160 = vmatpush.msrb.mxu0 %v122_v34  ;;  %967 = vmatpush.msra.mxu1 %v122_v34 }
  0xa5   :  { %926 = vmatmul.msk.f32.vlgmr.msrb.gmra.mxu0 %vm138_vm1, %v124_v35  ;;  %927 = vmatmul.msk.f32.vlgmr.msra.gmra.mxu1 %vm138_vm1, %v125_v36 }
 0x122   :  { %v162_v39 = vpop.f32.mrf.mxu0  ;;  %v165_v40 = vpop.f32.mrf.mxu1 }
 0x123   :  { %v163_v41 = vadd.f32 %v162_v39, %v131_v38  ;;  %v166_v42 = vadd.f32 %v165_v40, %v136_v37  ;;  %v356_v37 = vpop.permute.xlu2 %355  ;;  %v351_v38 = vpop.permute.xlu0 %350 }
 0x125   :  { %v169_v43 = vmax.f32 %v166_v42, 0.0  ;;  %v168_v44 = vmax.f32 %v163_v41, 0.0  ;;  %v346_v42 = vpop.permute.xlu1 %345 }
 0x127   :  { %194 = vmatpush.msra.mxu2 %v169_v43 }
 0x129   :  { %195 = vmatpush.msra.mxu2 %v168_v44 }
 0x12a   :  { %928 = vmatmul.msk.f32.vlgmr.msra.gmra.mxu2 %vm138_vm1, %v170_v45 }
 0x1ad   :  { %v197_v47 = vpop.f32.mrf.mxu2 }
 0x1ae   :  { %929 = vmatpush.msk.msra.mxu3 %vm207_vm2, %v197_v47 }
 0x1af   :  { %930 = vmatmul.msk.f32.vlgmr.msra.gmra.mxu3 %vm200_vm3, %v171_v46 }
 0x1b7   :  { %931 = vmatmul.msk.f32.gmra.mxu3 %vm200_vm3, %v172_v48 }
 0x232   :  { %v228_v50 = vpop.f32.mrf.mxu3 }
 0x233   :  { %v234_v52 = vsub.f32 %v168_v44, %v228_v50  ;;  %v403_v50 = vld [vmem:[%s1371_s11] sm:$0xff] }
 0x235   :  { %v236_v55 = vmul.f32 %v234_v52, %v234_v52 }
 0x23a   :  { %v231_v51 = vpop.f32.mrf.mxu3 }
 0x23b   :  { %v235_v53 = vsub.f32 %v169_v43, %v231_v51  ;;  %v404_v51 = vld [vmem:[%s1371_s11 + $0x8] sm:$0xff] }
 0x23d   :  { %v237_v54 = vmul.f32 %v235_v53, %v235_v53 }
 0x23f   :  { %252 = vmatpush.msrb.mxu2 %v237_v54  ;;  %v410_v54 = vpop.permute.xlu1 %409 }
 0x241   :  { %253 = vmatpush.msrb.mxu2 %v236_v55 }
 0x242   :  { %932 = vmatmul.msk.f32.vlgmr.msrb.gmra.mxu2 %vm138_vm1, %v170_v45  ;;  %v341_v45 = vpop.permute.xlu2 %340 }
 0x2c5   :  { %v255_v60 = vpop.f32.mrf.mxu2 }
 0x2c6   :  { %933 = vmatpush.msk.msrb.mxu3 %vm207_vm2, %v255_v60  ;;  %v448_v60 = vld [vmem:[%s1372_s13] sm:$0x3] }
 0x2c7   :  { %934 = vmatmul.msk.f32.vlgmr.msrb.gmra.mxu3 %vm200_vm3, %v171_v46 }
 0x2cf   :  { %935 = vmatmul.msk.f32.gmra.mxu3 %vm200_vm3, %v172_v48 }
 0x34a   :  { %v278_v2 = vpop.f32.mrf.mxu3 }
 0x34b   :  { %v279_v3 = vadd.f32 1e-05, %v278_v2 }
 0x34d   :  { %972 = vrsqrt.f32 %v279_v3  ;;  %vm290_vm5 = vweird.f32 %v279_v3 }
 0x352   :  { %v281_v4 = vpop.f32.mrf.mxu3 }
 0x353   :  { %v973_v5 = vpop.eup %972  ;;  %v282_v6 = vadd.f32 1e-05, %v281_v4 }
 0x354   :  { %v285_v7 = vmul.f32 %v973_v5, %v279_v3  ;;  %vm291_vm4 = vweird.f32 %v973_v5 }
 0x355   :  { %974 = vrsqrt.f32 %v282_v6  ;;  %vm292_vm6 = vmor %vm290_vm5, %vm291_vm4  ;;  %vm300_vm8 = vweird.f32 %v282_v6  ;;  %vm717_vm4 = vcmask 31744  }
 0x356   :  { %v286_v8 = vmul.f32 %v973_v5, %v285_v7 }
 0x358   :  { %v287_v9 = vmul.f32 0.5, %v286_v8 }
 0x35a   :  { %v288_v10 = vsub.f32 1.5, %v287_v9 }
 0x35b   :  { %v975_v11 = vpop.eup %974 }
 0x35c   :  { %v295_v12 = vmul.f32 %v975_v11, %v282_v6  ;;  %v289_v14 = vmul.f32 %v973_v5, %v288_v10  ;;  %vm301_vm7 = vweird.f32 %v975_v11 }
 0x35d   :  { %vm302_vm9 = vmor %vm300_vm8, %vm301_vm7  ;;  %vm915_vm7 = vcmask 64512  }
 0x35e   :  { %v296_v15 = vmul.f32 %v975_v11, %v295_v12  ;;  %v293_v18 = vsel %vm292_vm6, %v973_v5, %v289_v14 }
 0x35f   :  { %v304_v20 = vmul.f32 %v293_v18, %v234_v52 }
 0x360   :  { %v297_v16 = vmul.f32 0.5, %v296_v15 }
 0x361   :  { %v316_v25 = vmul.f32 %v309_v23, %v304_v20 }
 0x362   :  { %v298_v17 = vsub.f32 1.5, %v297_v16 }
 0x363   :  { %v328_v29 = vadd.f32 %v321_v28, %v316_v25 }
 0x364   :  { %v299_v19 = vmul.f32 %v975_v11, %v298_v17 }
 0x366   :  { %v303_v21 = vsel %vm302_vm9, %v975_v11, %v299_v19 }
 0x367   :  { %v305_v22 = vmul.f32 %v303_v21, %v235_v53  ;;  %v415_v53 = vpop.permute.xlu0 %414  ;;  %v592_v21 = vpop.permute.xlu2 %591 }
 0x369   :  { %v317_v24 = vmul.f32 %v314_v13, %v305_v22 }
 0x36b   :  { %v329_v27 = vadd.f32 %v326_v26, %v317_v24 }
 0x36d   :  { %384 = vmatpush.msrb.mxu1 %v329_v27 }
 0x36f   :  { %385 = vmatpush.msrb.mxu1 %v328_v29  ;;  %v587_v28 = vpop.permute.xlu0 %586 }
 0x370   :  { %936 = vmatmul.msk.f32.vlgmr.msrb.gmra.mxu1 %vm138_vm1, %v330_v30 }
 0x378   :  { %937 = vmatmul.msk.f32.gmra.mxu1 %vm138_vm1, %v331_v31  ;;  %v604_v31 = vpop.permute.xlu1 %603 }
 0x380   :  { %938 = vmatmul.msk.f32.gmra.mxu1 %vm138_vm1, %v332_v32 }
 0x388   :  { %939 = vmatmul.msk.f32.gmra.mxu1 %vm138_vm1, %v333_v33  ;;  %v599_v33 = vpop.permute.xlu2 %598 }
 0x3ed   :  { %v387_v34 = vpop.f32.mrf.mxu1 }
 0x3ee   :  { %v388_v46 = vadd.f32 %v387_v34, %v341_v45 }
 0x3f0   :  { %v399_v49 = vmax.f32 %v388_v46, 0.0 }
 0x3f5   :  { %v390_v35 = vpop.f32.mrf.mxu1 }
 0x3f6   :  { %v391_v43 = vadd.f32 %v390_v35, %v346_v42  ;;  %v608_v35 = vld [vmem:[%s1374_s17] sm:$0xff]  ;;  %v634_v42 = vpop.permute.xlu0 %633 }
 0x3f8   :  { %v400_v48 = vmax.f32 %v391_v43, 0.0  ;;  %v629_v43 = vpop.permute.xlu1 %628 }
 0x3fd   :  { %v393_v36 = vpop.f32.mrf.mxu1 }
 0x3fe   :  { %v394_v40 = vadd.f32 %v393_v36, %v351_v38  ;;  %v609_v36 = vld [vmem:[%s1374_s17 + $0x8] sm:$0xff]  ;;  %v611_v38 = vld [vmem:[%s1374_s17 + $0x18] sm:$0xff] }
 0x400   :  { %v401_v47 = vmax.f32 %v394_v40, 0.0 }
 0x405   :  { %v396_v39 = vpop.f32.mrf.mxu1 }
 0x406   :  { %v397_v41 = vadd.f32 %v396_v39, %v356_v37  ;;  %v610_v37 = vld [vmem:[%s1374_s17 + $0x10] sm:$0xff] }
 0x408   :  { %v402_v44 = vmax.f32 %v397_v41, 0.0 }
 0x40a   :  { %435 = vmatpush.msra.mxu2 %v402_v44 }
 0x40c   :  { %436 = vmatpush.msra.mxu2 %v401_v47  ;;  %v624_v47 = vpop.permute.xlu2 %623 }
 0x40e   :  { %437 = vmatpush.msra.mxu2 %v400_v48 }
 0x410   :  { %438 = vmatpush.msra.mxu2 %v399_v49 }
 0x411   :  { %940 = vmatmul.msk.f32.vlgmr.msra.gmra.mxu2 %vm92_vm0, %v403_v50  ;;  %v619_v50 = vpop.permute.xlu0 %618 }
 0x419   :  { %941 = vmatmul.msk.f32.gmra.mxu2 %vm92_vm0, %v404_v51 }
 0x494   :  { %v440_v52 = vpop.f32.mrf.mxu2 }
 0x495   :  { %v441_v56 = vadd.f32 %v440_v52, %v410_v54 }
 0x497   :  { %v446_v59 = vmax.f32 %v441_v56, 0.0  ;;  %v682_v56 = vld [vmem:[%s1376_s20] sm:$0xff] }
 0x49c   :  { %v443_v55 = vpop.f32.mrf.mxu2 }
 0x49d   :  { %v444_v57 = vadd.f32 %v443_v55, %v415_v53  ;;  %v681_v55 = vld [vmem:[%s1375_s19] sm:$0xf] }
 0x49f   :  { %v447_v58 = vmax.f32 %v444_v57, 0.0 }
 0x4a1   :  { %472 = vmatpush.msra.mxu0 %v447_v58 }
 0x4a3   :  { %473 = vmatpush.msra.mxu0 %v446_v59 }
 0x4a4   :  { %942 = vmatmul.msk.f32.vlgmr.msra.gmra.mxu0 %vm138_vm1, %v448_v60 }
 0x521   :  { %v475_v62 = vpop.f32.mrf.mxu0 }
 0x522   :  { %943 = vmatpush.msk.msrb.mxu2 %vm485_vm10, %v475_v62 }
 0x523   :  { %944 = vmatmul.msk.f32.vlgmr.msrb.gmra.mxu2 %vm478_vm11, %v449_v61 }
 0x52b   :  { %945 = vmatmul.msk.f32.gmra.mxu2 %vm478_vm11, %v450_v63 }
 0x5a6   :  { %v506_v0 = vpop.f32.mrf.mxu2 }
 0x5a7   :  { %v512_v2 = vsub.f32 %v446_v59, %v506_v0  ;;  %v684_v59 = vld [vmem:[%s1376_s20 + $0x10] sm:$0xff] }
 0x5a9   :  { %v514_v5 = vmul.f32 %v512_v2, %v512_v2 }
 0x5ae   :  { %v509_v1 = vpop.f32.mrf.mxu2 }
 0x5af   :  { %v513_v3 = vsub.f32 %v447_v58, %v509_v1  ;;  %v683_v58 = vld [vmem:[%s1376_s20 + $0x8] sm:$0xff] }
 0x5b1   :  { %v515_v4 = vmul.f32 %v513_v3, %v513_v3 }
 0x5b3   :  { %530 = vmatpush.msra.mxu3 %v515_v4 }
 0x5b5   :  { %531 = vmatpush.msra.mxu3 %v514_v5 }
 0x5b6   :  { %946 = vmatmul.msk.f32.vlgmr.msra.gmra.mxu3 %vm138_vm1, %v448_v60  ;;  %v685_v60 = vld [vmem:[%s1376_s20 + $0x18] sm:$0xff] }
 0x639   :  { %v533_v6 = vpop.f32.mrf.mxu3 }
 0x63a   :  { %947 = vmatpush.msk.msra.mxu2 %vm485_vm10, %v533_v6 }
 0x63b   :  { %948 = vmatmul.msk.f32.vlgmr.msra.gmra.mxu2 %vm478_vm11, %v449_v61 }
 0x643   :  { %949 = vmatmul.msk.f32.gmra.mxu2 %vm478_vm11, %v450_v63 }
 0x6be   :  { %v556_v7 = vpop.f32.mrf.mxu2 }
 0x6bf   :  { %v557_v8 = vadd.f32 1e-05, %v556_v7 }
 0x6c1   :  { %976 = vrsqrt.f32 %v557_v8  ;;  %vm568_vm13 = vweird.f32 %v557_v8 }
 0x6c6   :  { %v559_v9 = vpop.f32.mrf.mxu2 }
 0x6c7   :  { %v977_v10 = vpop.eup %976  ;;  %v560_v11 = vadd.f32 1e-05, %v559_v9 }
 0x6c8   :  { %v563_v12 = vmul.f32 %v977_v10, %v557_v8  ;;  %vm569_vm12 = vweird.f32 %v977_v10 }
 0x6c9   :  { %978 = vrsqrt.f32 %v560_v11  ;;  %vm570_vm14 = vmor %vm568_vm13, %vm569_vm12  ;;  %vm578_vm2 = vweird.f32 %v560_v11 }
 0x6ca   :  { %v564_v13 = vmul.f32 %v977_v10, %v563_v12 }
 0x6cc   :  { %v565_v14 = vmul.f32 0.5, %v564_v13 }
 0x6ce   :  { %v566_v15 = vsub.f32 1.5, %v565_v14 }
 0x6cf   :  { %v979_v16 = vpop.eup %978 }
 0x6d0   :  { %v573_v17 = vmul.f32 %v979_v16, %v560_v11  ;;  %v567_v18 = vmul.f32 %v977_v10, %v566_v15  ;;  %vm579_vm15 = vweird.f32 %v979_v16 }
 0x6d1   :  { %vm580_vm3 = vmor %vm578_vm2, %vm579_vm15 }
 0x6d2   :  { %v574_v19 = vmul.f32 %v979_v16, %v573_v17  ;;  %v571_v22 = vsel %vm570_vm14, %v977_v10, %v567_v18  ;;  %v875_v17 = vpop.permute.xlu2 %874 }
 0x6d3   :  { %v582_v25 = vmul.f32 %v571_v22, %v512_v2 }
 0x6d4   :  { %v575_v20 = vmul.f32 0.5, %v574_v19 }
 0x6d5   :  { %v594_v30 = vmul.f32 %v587_v28, %v582_v25  ;;  %v870_v25 = vpop.permute.xlu1 %869 }
 0x6d6   :  { %v576_v23 = vsub.f32 1.5, %v575_v20 }
 0x6d7   :  { %v606_v34 = vadd.f32 %v599_v33, %v594_v30 }
 0x6d8   :  { %v577_v24 = vmul.f32 %v979_v16, %v576_v23 }
 0x6da   :  { %v581_v26 = vsel %vm580_vm3, %v979_v16, %v577_v24 }
 0x6db   :  { %v583_v27 = vmul.f32 %v581_v26, %v513_v3 }
 0x6dd   :  { %v595_v29 = vmul.f32 %v592_v21, %v583_v27 }
 0x6df   :  { %v607_v32 = vadd.f32 %v604_v31, %v595_v29  ;;  %v880_v29 = vpop.permute.xlu0 %879 }
 0x6e1   :  { %662 = vmatpush.msrb.mxu3 %v607_v32  ;;  %v894_v32 = vpop.permute.xlu2 %893 }
 0x6e3   :  { %663 = vmatpush.msrb.mxu3 %v606_v34 }
 0x6e4   :  { %950 = vmatmul.msk.f32.vlgmr.msrb.gmra.mxu3 %vm138_vm1, %v608_v35 }
 0x6ec   :  { %951 = vmatmul.msk.f32.gmra.mxu3 %vm138_vm1, %v609_v36 }
 0x6f4   :  { %952 = vmatmul.msk.f32.gmra.mxu3 %vm138_vm1, %v610_v37 }
 0x6fc   :  { %953 = vmatmul.msk.f32.gmra.mxu3 %vm138_vm1, %v611_v38  ;;  %vm730_vm1 = vcmask 1043456  }
 0x767   :  { %v665_v39 = vpop.f32.mrf.mxu3 }
 0x768   :  { %v666_v51 = vadd.f32 %v665_v39, %v619_v50 }
 0x76a   :  { %v677_v54 = vmax.f32 %v666_v51, 0.0 }
 0x76f   :  { %v668_v40 = vpop.f32.mrf.mxu3 }
 0x770   :  { %v669_v48 = vadd.f32 %v668_v40, %v624_v47 }
 0x772   :  { %v678_v53 = vmax.f32 %v669_v48, 0.0 }
 0x777   :  { %v671_v41 = vpop.f32.mrf.mxu3 }
 0x778   :  { %v672_v45 = vadd.f32 %v671_v41, %v629_v43  ;;  %v885_v43 = vpop.permute.xlu1 %884 }
 0x77a   :  { %v679_v52 = vmax.f32 %v672_v45, 0.0 }
 0x77f   :  { %v674_v44 = vpop.f32.mrf.mxu3 }
 0x780   :  { %v675_v46 = vadd.f32 %v674_v44, %v634_v42 }
 0x782   :  { %v680_v49 = vmax.f32 %v675_v46, 0.0  ;;  %v899_v46 = vpop.permute.xlu0 %898 }
 0x784   :  { %709 = vmatpush.msrb.mxu0 %v680_v49 }
 0x786   :  { %710 = vmatpush.msrb.mxu0 %v679_v52 }
 0x788   :  { %711 = vmatpush.msrb.mxu0 %v678_v53 }
 0x78a   :  { %712 = vmatpush.msrb.mxu0 %v677_v54 }
 0x78b   :  { %954 = vmatmul.msk.f32.vlgmr.msrb.gmra.mxu0 %vm92_vm0, %v681_v55 }
 0x808   :  { %v714_v57 = vpop.f32.mrf.mxu0 }
 0x809   :  { %955 = vmatpush.msk.msra.mxu1 %vm730_vm1, %v714_v57  ;;  %v904_v57 = vpop.permute.xlu1 %903 }
 0x80a   :  { %956 = vmatmul.msk.f32.vlgmr.msra.gmra.mxu1 %vm717_vm4, %v682_v56 }
 0x812   :  { %957 = vmatmul.msk.f32.gmra.mxu1 %vm717_vm4, %v683_v58 }
 0x81a   :  { %958 = vmatmul.msk.f32.gmra.mxu1 %vm717_vm4, %v684_v59 }
 0x822   :  { %959 = vmatmul.msk.f32.gmra.mxu1 %vm717_vm4, %v685_v60 }
 0x887   :  { %v751_v61 = vpop.f32.mrf.mxu1 }
 0x888   :  { %v763_v5 = vsub.f32 %v677_v54, %v751_v61 }
 0x88a   :  { %v767_v8 = vmul.f32 %v763_v5, %v763_v5 }
 0x88f   :  { %v754_v62 = vpop.f32.mrf.mxu1 }
 0x890   :  { %v764_v3 = vsub.f32 %v678_v53, %v754_v62 }
 0x892   :  { %v768_v7 = vmul.f32 %v764_v3, %v764_v3 }
 0x897   :  { %v757_v63 = vpop.f32.mrf.mxu1 }
 0x898   :  { %v1322_v1 = vsub.f32 %v679_v52, %v757_v63 }
 0x89a   :  { %v769_v6 = vmul.f32 %v1322_v1, %v1322_v1 }
 0x89f   :  { %v760_v0 = vpop.f32.mrf.mxu1 }
 0x8a0   :  { %v1324_v2 = vsub.f32 %v680_v49, %v760_v0  ;;  %v909_v0 = vpop.permute.xlu2 %908 }
 0x8a2   :  { %v770_v4 = vmul.f32 %v1324_v2, %v1324_v2 }
 0x8a4   :  { %783 = vmatpush.msrb.mxu2 %v770_v4 }
 0x8a6   :  { %784 = vmatpush.msrb.mxu2 %v769_v6 }
 0x8a8   :  { %785 = vmatpush.msrb.mxu2 %v768_v7 }
 0x8aa   :  { %786 = vmatpush.msrb.mxu2 %v767_v8 }
 0x8ab   :  { %960 = vmatmul.msk.f32.vlgmr.msrb.gmra.mxu2 %vm92_vm0, %v681_v55 }
 0x92e   :  { %v788_v9 = vpop.f32.mrf.mxu2 }
 0x92f   :  { %961 = vmatpush.msk.msra.mxu0 %vm730_vm1, %v788_v9 }
 0x930   :  { %962 = vmatmul.msk.f32.vlgmr.msra.gmra.mxu0 %vm717_vm4, %v682_v56 }
 0x938   :  { %963 = vmatmul.msk.f32.gmra.mxu0 %vm717_vm4, %v683_v58 }
 0x940   :  { %964 = vmatmul.msk.f32.gmra.mxu0 %vm717_vm4, %v684_v59 }
 0x948   :  { %965 = vmatmul.msk.f32.gmra.mxu0 %vm717_vm4, %v685_v60 }
 0x9ad   :  { %v811_v10 = vpop.f32.mrf.mxu0 }
 0x9ae   :  { %v812_v11 = vadd.f32 1e-05, %v811_v10 }
 0x9b0   :  { %980 = vrsqrt.f32 %v812_v11  ;;  %vm829_vm5 = vweird.f32 %v812_v11 }
 0x9b5   :  { %v814_v12 = vpop.f32.mrf.mxu0 }
 0x9b6   :  { %v981_v13 = vpop.eup %980  ;;  %v815_v14 = vadd.f32 1e-05, %v814_v12 }
 0x9b7   :  { %v824_v15 = vmul.f32 %v981_v13, %v812_v11  ;;  %vm830_vm0 = vweird.f32 %v981_v13 }
 0x9b8   :  { %982 = vrsqrt.f32 %v815_v14  ;;  %vm831_vm6 = vmor %vm829_vm5, %vm830_vm0  ;;  %vm839_vm9 = vweird.f32 %v815_v14 }
 0x9b9   :  { %v825_v16 = vmul.f32 %v981_v13, %v824_v15 }
 0x9bb   :  { %v826_v18 = vmul.f32 0.5, %v825_v16 }
 0x9bd   :  { %v827_v19 = vsub.f32 1.5, %v826_v18  ;;  %v817_v20 = vpop.f32.mrf.mxu0 }
 0x9be   :  { %v983_v21 = vpop.eup %982  ;;  %v818_v22 = vadd.f32 1e-05, %v817_v20 }
 0x9bf   :  { %v828_v23 = vmul.f32 %v981_v13, %v827_v19  ;;  %v834_v24 = vmul.f32 %v983_v21, %v815_v14  ;;  %vm840_vm8 = vweird.f32 %v983_v21 }
 0x9c0   :  { %984 = vrsqrt.f32 %v818_v22  ;;  %vm841_vm10 = vmor %vm839_vm9, %vm840_vm8  ;;  %vm849_vm12 = vweird.f32 %v818_v22 }
 0x9c1   :  { %v832_v26 = vsel %vm831_vm6, %v981_v13, %v828_v23  ;;  %v835_v27 = vmul.f32 %v983_v21, %v834_v24 }
 0x9c2   :  { %v863_v28 = vmul.f32 %v832_v26, %v763_v5 }
 0x9c3   :  { %v836_v30 = vmul.f32 0.5, %v835_v27 }
 0x9c4   :  { %v887_v31 = vmul.f32 %v870_v25, %v863_v28 }
 0x9c5   :  { %v837_v33 = vsub.f32 1.5, %v836_v30  ;;  %v820_v34 = vpop.f32.mrf.mxu0 }
 0x9c6   :  { %v985_v35 = vpop.eup %984  ;;  %v911_v36 = vadd.f32 %v894_v32, %v887_v31  ;;  %v821_v37 = vadd.f32 1e-05, %v820_v34 }
 0x9c7   :  { %v838_v38 = vmul.f32 %v983_v21, %v837_v33  ;;  %v844_v39 = vmul.f32 %v985_v35, %v818_v22  ;;  %vm850_vm11 = vweird.f32 %v985_v35 }
 0x9c8   :  { %916 = vst.msk [vmem:[%s1377_s23] sm:$0xff] %vm915_vm7, %v911_v36  ;;  %986 = vrsqrt.f32 %v821_v37  ;;  %vm851_vm13 = vmor %vm849_vm12, %vm850_vm11  ;;  %vm859_vm15 = vweird.f32 %v821_v37 }
 0x9c9   :  { %v842_v40 = vsel %vm841_vm10, %v983_v21, %v838_v38  ;;  %v845_v41 = vmul.f32 %v985_v35, %v844_v39 }
 0x9ca   :  { %v864_v42 = vmul.f32 %v842_v40, %v764_v3 }
 0x9cb   :  { %v846_v44 = vmul.f32 0.5, %v845_v41 }
 0x9cc   :  { %v888_v45 = vmul.f32 %v875_v17, %v864_v42 }
 0x9cd   :  { %v847_v47 = vsub.f32 1.5, %v846_v44 }
 0x9ce   :  { %v987_v48 = vpop.eup %986  ;;  %v912_v49 = vadd.f32 %v899_v46, %v888_v45 }
 0x9cf   :  { %v848_v50 = vmul.f32 %v985_v35, %v847_v47  ;;  %v854_v51 = vmul.f32 %v987_v48, %v821_v37  ;;  %vm860_vm14 = vweird.f32 %v987_v48 }
 0x9d0   :  { %917 = vst.msk [vmem:[%s1377_s23 + $0x8] sm:$0xff] %vm915_vm7, %v912_v49  ;;  %vm861_vm2 = vmor %vm859_vm15, %vm860_vm14 }
 0x9d1   :  { %v852_v52 = vsel %vm851_vm13, %v985_v35, %v848_v50  ;;  %v855_v53 = vmul.f32 %v987_v48, %v854_v51 }
 0x9d2   :  { %v865_v54 = vmul.f32 %v852_v52, %v1322_v1 }
 0x9d3   :  { %v856_v55 = vmul.f32 0.5, %v855_v53 }
 0x9d4   :  { %v889_v56 = vmul.f32 %v880_v29, %v865_v54 }
 0x9d5   :  { %v857_v58 = vsub.f32 1.5, %v856_v55 }
 0x9d6   :  { %v913_v59 = vadd.f32 %v904_v57, %v889_v56 }
 0x9d7   :  { %v858_v60 = vmul.f32 %v987_v48, %v857_v58 }
 0x9d8   :  { %918 = vst.msk [vmem:[%s1377_s23 + $0x10] sm:$0xff] %vm915_vm7, %v913_v59 }
 0x9d9   :  { %v862_v61 = vsel %vm861_vm2, %v987_v48, %v858_v60 }
 0x9da   :  { %v866_v62 = vmul.f32 %v862_v61, %v1324_v2 }
 0x9dc   :  { %v890_v63 = vmul.f32 %v885_v43, %v866_v62 }
 0x9de   :  { %v914_v1 = vadd.f32 %v909_v0, %v890_v63 }
 0x9e0   :  { %919 = vst.msk [vmem:[%s1377_s23 + $0x18] sm:$0xff] %vm915_vm7, %v914_v1 }

</bundles_post_ra>
